<compile_context>
chip_gen: v7x
topology: tpu7x:2x2x1
jax: 0.10.0
libtpu: 0.0.40
codegen_flags: <defaults>
</compile_context>

<pallas_src>
import functools

import jax
import jax.numpy as jnp
from jax.experimental import pallas as pl
from jax.experimental.pallas import tpu as pltpu


def _server_model_kernel(x_ref, w_ref, b_ref, o_ref, *, c_actual):
    # x: (TB, D), w: (D, C_PAD), b: (1, C_PAD), o: (TB, C_PAD)
    x = x_ref[...]
    w = w_ref[...]
    b = b_ref[...]

    # Linear: logits = x @ W + b.  N is lane-dense (128); f32 accumulation.
    logits = jnp.dot(x, w, preferred_element_type=jnp.float32) + b

    # Mask padded class lanes to a large negative so exp() contributes 0.
    lane = jax.lax.broadcasted_iota(jnp.int32, logits.shape, 1)
    logits = jnp.where(lane < c_actual, logits, jnp.float32(-1e30))

    # Numerically stable LogSoftmax along dim=1.
    m = jnp.max(logits, axis=1, keepdims=True)
    z = logits - m
    lse = jnp.log(jnp.sum(jnp.exp(z), axis=1, keepdims=True))
    o_ref[...] = (z - lse).astype(o_ref.dtype)


def server_model_forward(x, w, b, *, block_b=1024):
    """x: (B, D) f32, w: (D, C) f32 (pre-transposed vs. PyTorch), b: (C,) f32
    -> (B, C) f32 log-probabilities."""
    B, D = x.shape
    C = w.shape[1]

    # Lane-dense padded class width (multiple of 128).
    c_pad = ((C + 127) // 128) * 128
    w_p = jnp.pad(w, ((0, 0), (0, c_pad - C)))            # zero columns (masked in-kernel)
    b_p = jnp.pad(b, (0, c_pad - C)).reshape(1, c_pad)

    # Batch tile: multiple of 8 sublanes, capped by block_b; pad B up to a multiple.
    tb = min(block_b, ((B + 7) // 8) * 8)
    b_pad = ((B + tb - 1) // tb) * tb
    x_p = jnp.pad(x, ((0, b_pad - B), (0, 0))) if b_pad != B else x

    grid = (b_pad // tb,)
    kernel = functools.partial(_server_model_kernel, c_actual=C)

    itemsize = 4
    cost = pl.CostEstimate(
        flops=2 * b_pad * D * c_pad + 6 * b_pad * c_pad,
        transcendentals=b_pad * c_pad + b_pad,            # exp per element + log per row
        bytes_accessed=(x_p.size + w_p.size + b_p.size + b_pad * c_pad) * itemsize,
    )

    out = pl.pallas_call(
        kernel,
        out_shape=jax.ShapeDtypeStruct((b_pad, c_pad), jnp.float32),
        grid_spec=pltpu.PrefetchScalarGridSpec(
            num_scalar_prefetch=0,
            grid=grid,
            in_specs=[
                pl.BlockSpec((tb, D), lambda i: (i, 0)),        # x: streamed per batch tile
                pl.BlockSpec((D, c_pad), lambda i: (0, 0)),     # W: VMEM-resident
                pl.BlockSpec((1, c_pad), lambda i: (0, 0)),     # b: VMEM-resident
            ],
            out_specs=pl.BlockSpec((tb, c_pad), lambda i: (i, 0)),
        ),
        compiler_params=pltpu.CompilerParams(
            dimension_semantics=("parallel",),                  # shards across TCs on v7x
            vmem_limit_bytes=64 * 1024 * 1024,
        ),
        cost_estimate=cost,
    )(x_p, w_p, b_p)

    return out[:B, :C]


if __name__ == "__main__":
    # Small shapes consistent with the module: batch=8, input_size=32, classes=10.
    B, D, C = 8, 32, 10

    key = jax.random.PRNGKey(0)
    kx, kw, kb = jax.random.split(key, 3)

    x = jax.random.normal(kx, (B, D), dtype=jnp.float32)

    # nn.Linear default init: U(-1/sqrt(D), 1/sqrt(D)).  PyTorch weight is (C, D);
    # we store it pre-transposed as (D, C).
    bound = 1.0 / jnp.sqrt(jnp.float32(D))
    w = jax.random.uniform(kw, (D, C), dtype=jnp.float32, minval=-bound, maxval=bound)
    b = jax.random.uniform(kb, (C,), dtype=jnp.float32, minval=-bound, maxval=bound)

    out = server_model_forward(x, w, b)
    out = jax.block_until_ready(out)

    ref = jax.nn.log_softmax(x @ w + b[None, :], axis=1)
    assert out.shape == (B, C)
    assert jnp.allclose(out, ref, atol=1e-5, rtol=1e-5)

    # Exercise batch tiling + non-divisible padding path (multiple grid steps).
    B2 = 200
    x2 = jax.random.normal(jax.random.PRNGKey(1), (B2, D), dtype=jnp.float32)
    out2 = jax.block_until_ready(server_model_forward(x2, w, b, block_b=64))
    ref2 = jax.nn.log_softmax(x2 @ w + b[None, :], axis=1)
    assert out2.shape == (B2, C)
    assert jnp.allclose(out2, ref2, atol=1e-5, rtol=1e-5)

    print("KERNEL_OK")
</pallas_src>

<mosaic_0001>
module attributes {stable_mosaic.version = 11 : i64} {
  func.func @_server_model_kernel(%arg0: i32, %arg1: memref<8x32xf32, #tpu.memory_space<vmem>>, %arg2: memref<32x128xf32, #tpu.memory_space<vmem>>, %arg3: memref<1x128xf32, #tpu.memory_space<vmem>>, %arg4: memref<8x128xf32, #tpu.memory_space<vmem>>) attributes {dimension_semantics = [#tpu.dimension_semantics<parallel>], iteration_bounds = array<i64: 1>, scalar_prefetch = 0 : i64, scratch_operands = 0 : i64, tpu.core_type = #tpu.core_type<tc>, window_params = [{transform_indices = @transform_0, window_bounds = array<i64: 8, 32>}, {pipeline_mode = #tpu.pipeline_mode<synchronous>, transform_indices = @transform_1, window_bounds = array<i64: 32, 128>}, {pipeline_mode = #tpu.pipeline_mode<synchronous>, transform_indices = @transform_2, window_bounds = array<i64: 1, 128>}, {transform_indices = @transform_3, window_bounds = array<i64: 8, 128>}]} {
    %c0 = arith.constant 0 : index
    %c0_0 = arith.constant 0 : index
    %0 = vector.load %arg1[%c0, %c0_0] : memref<8x32xf32, #tpu.memory_space<vmem>>, vector<8x32xf32>
    %c0_1 = arith.constant 0 : index
    %c0_2 = arith.constant 0 : index
    %1 = vector.load %arg2[%c0_1, %c0_2] : memref<32x128xf32, #tpu.memory_space<vmem>>, vector<32x128xf32>
    %c0_3 = arith.constant 0 : index
    %c0_4 = arith.constant 0 : index
    %2 = vector.load %arg3[%c0_3, %c0_4] : memref<1x128xf32, #tpu.memory_space<vmem>>, vector<1x128xf32>
    %cst = arith.constant dense<0.000000e+00> : vector<8x128xf32>
    %3 = tpu.matmul %0, %1, %cst {dimension_numbers = #tpu.dot_dimension_numbers<[1], [0], [0], [1], [0, 0, 1, 1], [], []>} : vector<8x32xf32>, vector<32x128xf32>, vector<8x128xf32> -> vector<8x128xf32>
    %4 = vector.broadcast %2 : vector<1x128xf32> to vector<8x128xf32>
    %5 = arith.addf %3, %4 : vector<8x128xf32>
    %6 = tpu.iota {dimensions = array<i32: 1>} : vector<8x128xi32>
    %c10_i32 = arith.constant 10 : i32
    %7 = vector.broadcast %c10_i32 : i32 to vector<8x128xi32>
    %8 = arith.cmpi slt, %6, %7 : vector<8x128xi32>
    %cst_5 = arith.constant -1.000000e+30 : f32
    %9 = vector.broadcast %cst_5 : f32 to vector<8x128xf32>
    %10 = arith.select %8, %5, %9 : vector<8x128xi1>, vector<8x128xf32>
    %cst_6 = arith.constant dense<0xFF800000> : vector<8xf32>
    %11 = vector.multi_reduction <maximumf>, %10, %cst_6 [1] : vector<8x128xf32> to vector<8xf32>
    %12 = vector.shape_cast %11 : vector<8xf32> to vector<8x1xf32>
    %13 = vector.broadcast %12 : vector<8x1xf32> to vector<8x128xf32>
    %14 = arith.subf %10, %13 : vector<8x128xf32>
    %15 = math.exp %14 : vector<8x128xf32>
    %cst_7 = arith.constant dense<0.000000e+00> : vector<8xf32>
    %16 = vector.multi_reduction <add>, %15, %cst_7 [1] : vector<8x128xf32> to vector<8xf32>
    %17 = vector.shape_cast %16 : vector<8xf32> to vector<8x1xf32>
    %18 = math.log %17 : vector<8x1xf32>
    %19 = vector.broadcast %18 : vector<8x1xf32> to vector<8x128xf32>
    %20 = arith.subf %14, %19 : vector<8x128xf32>
    %c0_8 = arith.constant 0 : index
    %c0_9 = arith.constant 0 : index
    %21 = vector.load %arg4[%c0_8, %c0_9] : memref<8x128xf32, #tpu.memory_space<vmem>>, vector<8x128xf32>
    tpu.vector_store %arg4[%c0_8, %c0_9], %20 {strides = array<i32>} : memref<8x128xf32, #tpu.memory_space<vmem>>, vector<8x128xf32>,
    return
  }
  func.func @transform_0(%arg0: i32) -> (i32, i32) {
    %c0_i32 = arith.constant 0 : i32
    %c0_i32_0 = arith.constant 0 : i32
    return %arg0, %c0_i32 : i32, i32
  }
  func.func @transform_1(%arg0: i32) -> (i32, i32) {
    %c0_i32 = arith.constant 0 : i32
    %c0_i32_0 = arith.constant 0 : i32
    %c0_i32_1 = arith.constant 0 : i32
    return %c0_i32, %c0_i32_0 : i32, i32
  }
  func.func @transform_2(%arg0: i32) -> (i32, i32) {
    %c0_i32 = arith.constant 0 : i32
    %c0_i32_0 = arith.constant 0 : i32
    %c0_i32_1 = arith.constant 0 : i32
    return %c0_i32, %c0_i32_0 : i32, i32
  }
  func.func @transform_3(%arg0: i32) -> (i32, i32) {
    %c0_i32 = arith.constant 0 : i32
    %c0_i32_0 = arith.constant 0 : i32
    return %arg0, %c0_i32 : i32, i32
  }
}

</mosaic_0001>

<bundles_post_ra>
// kernel: tpu_custom_call.1
= control target key start
LH: loop header
LB: loop body
LE: loop exit
PB: predicated region body
PF: predicated region fallthrough
CT: control target
= control target key end

     0   :  { %8 = vsyncpa [#allocation3], 0  ;;  %s377_s0 = inlined_call_operand.hbm [shape: f32[8,32], index: 0, kind: input, shape index: {}]   ;;  %s378_s1 = inlined_call_operand.hbm [shape: f32[32,128], index: 1, kind: input, shape index: {}]   ;;  %s379_s2 = inlined_call_operand.hbm [shape: f32[1,128], index: 2, kind: input, shape index: {}]   ;;  %s380_s3 = inlined_call_operand.hbm [shape: f32[8,128], index: 3, kind: output, shape index: {}]  }
   0x1   :  { %9 = vsyncpa [#allocation6], 0 }
   0x2   :  { %10 = vsyncpa [#allocation4], 0  ;;  %s300_s12 = smov [#allocation5]   ;;  %s206_s16 = scalar_lea.hbm %s378_s1, 512 }
   0x3   :  { %s26_s13 = sshll.u32 %s300_s12, 4  ;;  %p207_p0 = scmp.ne.s32.totalorder %s378_s1, %s206_s16  ;;  %s27_s13 = int_to_ptr.vmem [resolvable:$true] %s26_s13 }
   0x4   :  { %p210_p1 = scmp.lt.u32.totalorder %s206_s16, %s378_s1 }
   0x6   :  { %p212_p2 = pnand %p210_p1, %p207_p0 }
   0x8   :  { %215 = shalt.err (!%p212_p2)
}
   0x9   :  { %s216_s21 = scalar_lea.vmem %s27_s13, 512  ;;  %p221_p4 = scmp.lt.s32.totalorder %s27_s13, %s27_s13 }
   0xa   :  { %p217_p3 = scmp.ne.s32.totalorder %s27_s13, %s216_s21  ;;  %p222_p5 = scmp.lt.s32.totalorder %s216_s21, %s216_s21 }
   0xc   :  { %p223_p6 = por %p222_p5, %p221_p4 }
   0xe   :  { %p224_p7 = pnand %p223_p6, %p217_p3 }
  0x10   :  { %227 = shalt.err (!%p224_p7)
}
  0x11   :  { %s301_s22 = smov 128   ;;  %s302_s23 = smov 8  }
  0x12   :  { %32 = dma.hbm_to_vmem [thread:$0]  %s378_s1, 512, %s27_s13, [#allocation6], %s301_s22, %s301_s22, %s302_s23  }
  0x13   :  { %s303_s26 = smov [#allocation2]   ;;  %s304_s28 = smov [#allocation7]  }
  0x14   :  { %s17_s27 = sshll.u32 %s303_s26, 4  ;;  %s39_s29 = sshll.u32 %s304_s28, 4  ;;  %s18_s27 = int_to_ptr.vmem [resolvable:$true] %s17_s27  ;;  %s40_s29 = int_to_ptr.vmem [resolvable:$true] %s39_s29 }
  0x15   :  { %s228_s5 = scalar_lea.hbm %s377_s0, 128 }
  0x16   :  { %p229_p8 = scmp.ne.s32.totalorder %s377_s0, %s228_s5  ;;  %p232_p9 = scmp.lt.u32.totalorder %s228_s5, %s377_s0 }
  0x18   :  { %p234_p10 = pnand %p232_p9, %p229_p8 }
  0x1a   :  { %237 = shalt.err (!%p234_p10)
}
  0x1b   :  { %s238_s1 = scalar_lea.vmem %s18_s27, 128  ;;  %p243_p12 = scmp.lt.s32.totalorder %s18_s27, %s18_s27 }
  0x1c   :  { %p239_p11 = scmp.ne.s32.totalorder %s18_s27, %s238_s1  ;;  %p244_p13 = scmp.lt.s32.totalorder %s238_s1, %s238_s1 }
  0x1e   :  { %p245_p0 = por %p244_p13, %p243_p12 }
  0x20   :  { %p246_p1 = pnand %p245_p0, %p239_p11 }
  0x22   :  { %249 = shalt.err (!%p246_p1)
}
  0x23   :  { %20 = dma.hbm_to_vmem [thread:$0]  %s377_s0, 128, %s18_s27, [#allocation3]  }
  0x24   :  { %s250_s14 = scalar_lea.hbm %s379_s2, 16 }
  0x25   :  { %p251_p2 = scmp.ne.s32.totalorder %s379_s2, %s250_s14  ;;  %p254_p3 = scmp.lt.u32.totalorder %s250_s14, %s379_s2 }
  0x27   :  { %p256_p4 = pnand %p254_p3, %p251_p2 }
  0x29   :  { %259 = shalt.err (!%p256_p4)
}
  0x2a   :  { %s260_s19 = scalar_lea.vmem %s40_s29, 16  ;;  %s264_s20 = scalar_lea.vmem %s40_s29, 32 }
  0x2b   :  { %p261_p5 = scmp.ne.s32.totalorder %s40_s29, %s260_s19  ;;  %p265_p6 = scmp.lt.s32.totalorder %s40_s29, %s40_s29 }
  0x2c   :  { %p266_p7 = scmp.lt.s32.totalorder %s264_s20, %s260_s19 }
  0x2e   :  { %p267_p8 = por %p266_p7, %p265_p6 }
  0x30   :  { %p268_p9 = pnand %p267_p8, %p261_p5 }
  0x32   :  { %271 = shalt.err (!%p268_p9)
}
  0x33   :  { %42 = dma.hbm_to_vmem [thread:$0]  %s379_s2, 16, %s40_s29, [#allocation6]  }
  0x34   :  { %294 = dma.done.wait [#allocation3], 128  }
  0x35   :  { %295 = vsyncadd [#allocation3], 4294967168 }
  0x36   :  { %296 = dma.done.wait [#allocation6], 528  }
  0x37   :  { %297 = vsyncadd [#allocation6], 4294966768  ;;  %v305_v0 = vmov 0.0|0.0   ;;  %vm306_vm0 = vmmov 0   ;;  %v307_v1 = vmov 0.0   ;;  %v53_v2 = vld [vmem:[#allocation5] sm:$0xff]  ;;  %v138_v9 = vlaneseq }
  0x38   :  { %187 = vmatprep.subr.bf16.mxu0 %v305_v0  ;;  %184 = vmatprep.mubr.msk.f32.mxu0 %vm306_vm0, %v307_v1  ;;  %v54_v3 = vld [vmem:[#allocation5 + $0x8] sm:$0xff]  ;;  %v55_v4 = vld [vmem:[#allocation5 + $0x10] sm:$0xff]  ;;  %v56_v6 = vld [vmem:[#allocation5 + $0x18] sm:$0xff]  ;;  %vm64_vm1 = vcmask 261120   ;;  %s308_s2 = smov [#allocation8]  }
  0x39   :  { %v188_v5 = vpack.c.bf16 %v54_v3, %v53_v2  ;;  %v191_v7 = vpack.c.bf16 %v56_v6, %v55_v4  ;;  %v52_v8 = vld [vmem:[#allocation2] sm:$0xff]  ;;  %v139_v10 = vand.u32 127, %v138_v9  ;;  %v169_v11 = vld [vmem:[#allocation7] ss:$0 sm:$0xff]  ;;  %s159_s22 = sshll.u32 %s308_s2, 4  ;;  %s160_s22 = int_to_ptr.vmem [resolvable:$true] %s159_s22 }
  0x3a   :  { %s272_s23 = scalar_lea.vmem %s160_s22, 128  ;;  %p277_p11 = scmp.lt.s32.totalorder %s160_s22, %s160_s22 }
  0x3b   :  { %189 = vmatpush3.bf16.msra.mxu0 %v188_v5  ;;  %vm140_vm2 = vcmp.lt.s32.totalorder %v139_v10, 10  ;;  %p273_p10 = scmp.ne.s32.totalorder %s160_s22, %s272_s23  ;;  %p278_p12 = scmp.lt.s32.totalorder %s272_s23, %s272_s23 }
  0x3c   :  { %190 = vmatprep.subr.bf16.mxu0 %v305_v0 }
  0x3d   :  { %p279_p13 = por %p278_p12, %p277_p11 }
  0x3f   :  { %192 = vmatpush3.bf16.msra.mxu0 %v191_v7  ;;  %p280_p0 = pnand %p279_p13, %p273_p10 }
  0x42   :  { %185 = vmatmul.mubr.msk.f32.vlgmr.msra.gmra.mrb[0].mxu0 %vm64_vm1, %v52_v8 }
 0x115   :  { %v134_v12 = vpop.f32.mrb[0].mxu0 }
 0x116   :  { %v135_v13 = vadd.f32 %v169_v11, %v134_v12  ;;  %v186_v14 = vpop.f32.mrb[1].mxu0 }
 0x118   :  { %v141_v15 = vsel %vm140_vm2, %v135_v13, -1e+30 }
 0x119   :  { %142 = vmax.xlane.f32.xlu0 %v141_v15 }
 0x1a6   :  { %v143_v16 = vpop.xlane.xlu0 %142 }
 0x1a7   :  { %v144_v17 = vsub.f32 %v141_v15, %v143_v16 }
 0x1a9   :  { %v145_v18 = vmul.f32 1.442695, %v144_v17 }
 0x1ab   :  { %202 = vpow2.f32 %v145_v18 }
 0x1b5   :  { %v203_v19 = vpop.eup %202 }
 0x1b6   :  { %147 = vadd.xlane.f32.xlu0 %v203_v19 }
 0x243   :  { %v148_v20 = vpop.xlane.xlu0 %147 }
 0x244   :  { %204 = vlog2.f32 %v148_v20 }
 0x24e   :  { %v205_v21 = vpop.eup %204 }
 0x24f   :  { %v150_v22 = vmul.f32 0.6931472, %v205_v21 }
 0x251   :  { %v151_v23 = vsub.f32 %v144_v17, %v150_v22 }
 0x253   :  { %152 = vst [vmem:[#allocation8] sm:$0xff] %v151_v23 }
 0x254   :  { %283 = shalt.err (!%p280_p0)
}
 0x255   :  { %s284_s26 = scalar_lea.hbm %s380_s3, 128 }
 0x256   :  { %p285_p1 = scmp.ne.s32.totalorder %s380_s3, %s284_s26  ;;  %p288_p2 = scmp.lt.u32.totalorder %s284_s26, %s380_s3 }
 0x258   :  { %p290_p3 = pnand %p288_p2, %p285_p1 }
 0x25a   :  { %293 = shalt.err (!%p290_p3)
}
 0x25b   :  { %162 = dma.vmem_to_hbm [thread:$0]  %s160_s22, 128, %s380_s3, [#allocation4]  }
 0x25c   :  { %298 = dma.done.wait [#allocation4], 128  }
 0x25d   :  { %299 = vsyncadd [#allocation4], 4294967168 }
 0x25e   :  { %166 = vsyncpa [#allocation3], 1 }
 0x25f   :  { %167 = vsyncpa [#allocation6], 1 }
 0x260   :  { %168 = vsyncpa [#allocation4], 1 }

</bundles_post_ra>
